<compile_context>
chip_gen: v5e
topology: v5e:2x2
jax: 0.10.0
libtpu: 0.0.40
codegen_flags: <defaults>
</compile_context>

<pallas_src>
import functools

import jax
import jax.numpy as jnp
from jax.experimental import pallas as pl
from jax.experimental.pallas import tpu as pltpu

LANE = 128


def _round_up(x, m):
    return (x + m - 1) // m * m


def _pad2(x, rows, cols):
    r, c = x.shape
    return jnp.pad(x, ((0, rows - r), (0, cols - c)))


@functools.lru_cache(maxsize=1)
def _vmem_budget_bytes():
    """Generation-aware scoped-VMEM budget (v5e/v6e: 128 MiB, v7x: 64 MiB)."""
    cap = 128 * 1024 * 1024
    try:
        info = pltpu.get_tpu_info()
        cap = int(getattr(info, "vmem_capacity_bytes", cap))
    except Exception:
        pass
    # ~25% headroom for compiler-internal scratch / double buffers.
    return min(cap * 3 // 4, 112 * 1024 * 1024)


def _pick_tile(n_p, want):
    """Largest multiple of 128 that divides n_p and is <= want (always >=128)."""
    best = 128
    t = 128
    while t <= min(want, n_p):
        if n_p % t == 0:
            best = t
        t += 128
    return best


# ---------------------------------------------------------------------------
# Fused kernel: whole encoder stack in a single pallas_call (small-N path)
# ---------------------------------------------------------------------------
def _fused_encoder_kernel(*refs, n_layers_total):
    a_ref, h0_ref = refs[0], refs[1]
    o_ref = refs[-1]
    wb_refs = refs[2:-1]

    a = a_ref[...]      # (Np, Np) bf16 — loaded once, reused across all layers
    h = h0_ref[...]     # (Np, F0p) bf16

    for l in range(n_layers_total):
        w = wb_refs[2 * l][...]        # (Fin_p, Fout_p) bf16, zero-padded
        b = wb_refs[2 * l + 1][...]    # (1, Fout_p) f32, zero-padded
        f_in_p, f_out_p = w.shape
        if f_out_p <= f_in_p:
            # project first: A @ (H @ W) — the N^2 matmul contracts the smaller dim
            hw = jnp.dot(h, w, preferred_element_type=jnp.float32)
            z = jnp.dot(a, hw.astype(jnp.bfloat16),
                        preferred_element_type=jnp.float32) + b
        else:
            # aggregate first: (A @ H) @ W
            ah = jnp.dot(a, h, preferred_element_type=jnp.float32)
            z = jnp.dot(ah.astype(jnp.bfloat16), w,
                        preferred_element_type=jnp.float32) + b
        if l < n_layers_total - 1:
            h = jnp.maximum(z, 0.0).astype(jnp.bfloat16)
        else:
            o_ref[...] = z.astype(o_ref.dtype)             # final layer: no activation


def encoder_forward_fused(params, a_hat, node_features, *, corrupt=False, key=None):
    """Encoder.forward (clean or corrupt) as a single fused pallas_call."""
    n, f_in = node_features.shape
    if corrupt:
        # torch.randperm over layer-0 node features; the edge-feature permutation
        # in the reference is a no-op for the GCN backbone (no edge features).
        perm = jax.random.permutation(key, n)
        node_features = node_features[perm]
    # TODO(synk): dropout is identity here (eval-mode forward); training-mode
    # dropout would need pltpu.prng_random_bits masking per layer.

    dims = [f_in] + [w.shape[1] for (w, _) in params]
    dims_p = [_round_up(d, LANE) for d in dims]
    n_p = _round_up(n, LANE)      # lane-dense N padding: unmasked loads/stores on A/out

    a_p = _pad2(a_hat, n_p, n_p).astype(jnp.bfloat16)
    h_p = _pad2(node_features, n_p, dims_p[0]).astype(jnp.bfloat16)

    inputs = [a_p, h_p]
    in_specs = [pl.BlockSpec(a_p.shape, lambda: (0, 0)),
                pl.BlockSpec(h_p.shape, lambda: (0, 0))]
    for l, (w, b) in enumerate(params):
        # Zero-padded W AND zero-padded bias keep the padded feature columns
        # exactly zero through relu, so later layers never see garbage.
        w_p = _pad2(w, dims_p[l], dims_p[l + 1]).astype(jnp.bfloat16)
        b_p = _pad2(b.reshape(1, -1), 1, dims_p[l + 1]).astype(jnp.float32)
        inputs += [w_p, b_p]
        in_specs += [pl.BlockSpec(w_p.shape, lambda: (0, 0)),
                     pl.BlockSpec(b_p.shape, lambda: (0, 0))]

    out_shape = (n_p, dims_p[-1])
    kernel = functools.partial(_fused_encoder_kernel, n_layers_total=len(params))
    out = pl.pallas_call(
        kernel,
        out_shape=jax.ShapeDtypeStruct(out_shape, jnp.float32),
        in_specs=in_specs,
        out_specs=pl.BlockSpec(out_shape, lambda: (0, 0)),
        compiler_params=pltpu.CompilerParams(vmem_limit_bytes=_vmem_budget_bytes()),
    )(*inputs)
    return out[:n, :dims[-1]]


# ---------------------------------------------------------------------------
# Tiled per-layer path (realistic N): projection kernel + aggregation kernel
# ---------------------------------------------------------------------------
def _project_kernel(h_ref, w_ref, o_ref):
    # (tp, Fin_p) @ (Fin_p, Fout_p) in bf16 on the MXU, f32 accumulate.
    o_ref[...] = jnp.dot(h_ref[...], w_ref[...],
                         preferred_element_type=jnp.float32).astype(o_ref.dtype)


def project_rows(h_p, w_p, *, out_dtype=jnp.bfloat16, tile_rows=512):
    """HW = H @ W, row-tiled. Cheap O(N * f_in * f_out) pass; W stays resident."""
    n_p, f_in_p = h_p.shape
    f_out_p = w_p.shape[1]
    tp = _pick_tile(n_p, tile_rows)
    return pl.pallas_call(
        _project_kernel,
        out_shape=jax.ShapeDtypeStruct((n_p, f_out_p), out_dtype),
        grid_spec=pltpu.PrefetchScalarGridSpec(
            num_scalar_prefetch=0,
            grid=(n_p // tp,),
            in_specs=[
                pl.BlockSpec((tp, f_in_p), lambda i: (i, 0)),
                pl.BlockSpec((f_in_p, f_out_p), lambda i: (0, 0)),   # W resident
            ],
            out_specs=pl.BlockSpec((tp, f_out_p), lambda i: (i, 0)),
        ),
        compiler_params=pltpu.CompilerParams(
            dimension_semantics=("parallel",),
            vmem_limit_bytes=_vmem_budget_bytes(),
        ),
    )(h_p, w_p)


def _aggregate_kernel(a_ref, hw_ref, b_ref, o_ref, acc_ref, *, apply_relu, tk):
    # Z[i] = sum_k A[i,k] @ HW[k]  (+ b, relu) — A is the only O(N^2) stream.
    k = pl.program_id(1)

    @pl.when(k == 0)
    def _init():
        acc_ref[...] = jnp.zeros_like(acc_ref)

    off = pl.multiple_of(k * tk, tk)
    acc_ref[...] += jnp.dot(a_ref[...], hw_ref[pl.ds(off, tk), :],
                            preferred_element_type=jnp.float32)

    @pl.when(k == pl.num_programs(1) - 1)
    def _finalize():
        z = acc_ref[...] + b_ref[...]
        if apply_relu:
            z = jnp.maximum(z, 0.0)
        o_ref[...] = z.astype(o_ref.dtype)


def aggregate_rows(a_p, hw_p, b_p, *, apply_relu, out_dtype, tm=512, tk=512):
    n_p = a_p.shape[0]
    f_out_p = hw_p.shape[1]
    tm = _pick_tile(n_p, tm)
    tk = _pick_tile(n_p, tk)
    kernel = functools.partial(_aggregate_kernel, apply_relu=apply_relu, tk=tk)
    # TODO(synk): on v5e/v6e an int8-quantized A (and fp8 on v7x) would halve the
    # dominant HBM stream; kept bf16 here to stay well inside the 5e-2 tolerance.
    return pl.pallas_call(
        kernel,
        out_shape=jax.ShapeDtypeStruct((n_p, f_out_p), out_dtype),
        grid_spec=pltpu.PrefetchScalarGridSpec(
            num_scalar_prefetch=0,
            grid=(n_p // tm, n_p // tk),          # reduction (k) axis last
            in_specs=[
                pl.BlockSpec((tm, tk), lambda i, k: (i, k)),        # A streamed once
                pl.BlockSpec((n_p, f_out_p), lambda i, k: (0, 0)),  # HW VMEM-resident
                pl.BlockSpec((1, f_out_p), lambda i, k: (0, 0)),    # bias resident
            ],
            out_specs=pl.BlockSpec((tm, f_out_p), lambda i, k: (i, 0)),
            scratch_shapes=[pltpu.VMEM((tm, f_out_p), jnp.float32)],
        ),
        compiler_params=pltpu.CompilerParams(
            dimension_semantics=("parallel", "arbitrary"),
            vmem_limit_bytes=_vmem_budget_bytes(),
        ),
    )(a_p, hw_p, b_p)


def encoder_forward_tiled(params, a_hat, node_features, *, corrupt=False, key=None,
                          tm=512, tk=512):
    n, f_in = node_features.shape
    h = node_features
    if corrupt:
        perm = jax.random.permutation(key, n)
        h = h[perm]
    # TODO(synk): dropout is identity (eval-mode forward).

    n_p = _round_up(n, LANE)
    # A is padded + cast to bf16 ONCE and reused for every layer.
    a_p = _pad2(a_hat, n_p, n_p).astype(jnp.bfloat16)
    # h stays padded bf16 between layers (no per-layer slice / re-pad round trips);
    # padded feature columns are exact zeros, padded rows never contaminate valid
    # rows because A's padded columns are zero.
    h_p = _pad2(h, n_p, _round_up(f_in, LANE)).astype(jnp.bfloat16)

    n_total = len(params)
    for l, (w, b) in enumerate(params):
        is_last = l == n_total - 1
        f_out_p = _round_up(w.shape[1], LANE)
        w_p = _pad2(w, h_p.shape[1], f_out_p).astype(jnp.bfloat16)
        b_p = _pad2(b.reshape(1, -1), 1, f_out_p).astype(jnp.float32)
        # Projection-first: the tiny N x f_in x f_out matmul contracts the input
        # dim, so the N^2-bound aggregation streams the narrower f_out_p operand.
        hw_p = project_rows(h_p, w_p, out_dtype=jnp.bfloat16)
        h_p = aggregate_rows(
            a_p, hw_p, b_p, apply_relu=not is_last,
            out_dtype=jnp.float32 if is_last else jnp.bfloat16, tm=tm, tk=tk)
    return h_p[:n, :params[-1][0].shape[1]]


def encoder_forward(params, a_hat, node_features, *, corrupt=False, key=None):
    """Generation-aware dispatch: fused (A resident for all layers) if it fits VMEM."""
    n = node_features.shape[0]
    n_p = _round_up(n, LANE)
    dims_p = [_round_up(d, LANE) for d in
              [node_features.shape[1]] + [w.shape[1] for (w, _) in params]]
    resident = n_p * n_p * 2 + 2 * n_p * max(dims_p) * 2
    resident += max(dims_p[i] * dims_p[i + 1] for i in range(len(params))) * 2
    if resident <= _vmem_budget_bytes() // 2:
        return encoder_forward_fused(params, a_hat, node_features,
                                     corrupt=corrupt, key=key)
    return encoder_forward_tiled(params, a_hat, node_features,
                                 corrupt=corrupt, key=key)


# ---------------------------------------------------------------------------
# Pure-JAX f32 reference (for correctness check with relaxed bf16 tolerance)
# ---------------------------------------------------------------------------
def encoder_reference(params, a_hat, node_features, *, corrupt=False, key=None):
    h = node_features
    if corrupt:
        perm = jax.random.permutation(key, h.shape[0])
        h = h[perm]
    n_total = len(params)
    for l, (w, b) in enumerate(params):
        z = a_hat @ (h @ w) + b
        h = jnp.maximum(z, 0.0) if l < n_total - 1 else z
    return h


# ---------------------------------------------------------------------------
# Deterministic parameter / input construction
# ---------------------------------------------------------------------------
def build_params(key, in_feats, n_hidden, n_layers):
    """MiniBatchGCNSampling stack: in->hidden, (n_layers-1)x hidden->hidden,
    hidden->n_classes(=n_hidden). Total n_layers + 1 linear layers."""
    dims = [in_feats] + [n_hidden] * n_layers + [n_hidden]
    params = []
    for i in range(len(dims) - 1):
        key, kw, kb = jax.random.split(key, 3)
        fan_in, fan_out = dims[i], dims[i + 1]
        stdv = 1.0 / jnp.sqrt(jnp.float32(fan_in))
        w = jax.random.uniform(kw, (fan_in, fan_out), jnp.float32, -stdv, stdv)
        b = jax.random.uniform(kb, (1, fan_out), jnp.float32, -stdv, stdv)
        params.append((w, b))
    return params


def build_normalized_adjacency(key, n_nodes):
    """Random graph, self loops, symmetric normalization D^-1/2 (A+I) D^-1/2."""
    logits = jax.random.uniform(key, (n_nodes, n_nodes))
    adj = (logits > 0.7).astype(jnp.float32)
    adj = jnp.maximum(adj, adj.T)
    adj = adj + jnp.eye(n_nodes, dtype=jnp.float32)
    deg = jnp.sum(adj, axis=1)
    d_inv_sqrt = 1.0 / jnp.sqrt(deg)
    return adj * d_inv_sqrt[:, None] * d_inv_sqrt[None, :]


if __name__ == "__main__":
    # Sampled NodeFlow-scale toy problem: 32 nodes, 16-dim input features,
    # 32-dim hidden, 1 hidden GCN layer (=> 2 linear layers total).
    N_NODES = 32
    IN_FEATS = 16
    N_HIDDEN = 32
    N_LAYERS = 1
    N_NODES_BIG = 256   # exercises the tiled path

    root = jax.random.PRNGKey(0)
    k_feat, k_adj, k_par, k_perm, k_feat_b, k_adj_b = jax.random.split(root, 6)

    node_features = jax.random.normal(k_feat, (N_NODES, IN_FEATS), jnp.float32)
    a_hat = build_normalized_adjacency(k_adj, N_NODES)
    params = build_params(k_par, IN_FEATS, N_HIDDEN, N_LAYERS)

    fused = jax.jit(encoder_forward_fused, static_argnames=("corrupt",))
    tiled = jax.jit(encoder_forward_tiled, static_argnames=("corrupt", "tm", "tk"))
    auto = jax.jit(encoder_forward, static_argnames=("corrupt",))

    # --- fused path: clean + corrupt forward, whole stack in one pallas_call ---
    feats = fused(params, a_hat, node_features, corrupt=False)
    feats_corrupt = fused(params, a_hat, node_features, corrupt=True, key=k_perm)
    jax.block_until_ready((feats, feats_corrupt))

    ref = encoder_reference(params, a_hat, node_features, corrupt=False)
    ref_corrupt = encoder_reference(params, a_hat, node_features,
                                    corrupt=True, key=k_perm)
    assert feats.shape == (N_NODES, N_HIDDEN)
    assert feats_corrupt.shape == (N_NODES, N_HIDDEN)
    assert float(jnp.max(jnp.abs(feats - ref))) < 5e-2
    assert float(jnp.max(jnp.abs(feats_corrupt - ref_corrupt))) < 5e-2

    # --- tiled path: larger graph, projection-first + gridded aggregation ---
    node_features_big = jax.random.normal(
        k_feat_b, (N_NODES_BIG, IN_FEATS), jnp.float32)
    a_hat_big = build_normalized_adjacency(k_adj_b, N_NODES_BIG)
    ref_big = encoder_reference(params, a_hat_big, node_features_big, corrupt=False)

    # Default (large) tiles — grid collapses to (1,1) at this small test N.
    feats_big = tiled(params, a_hat_big, node_features_big, corrupt=False)
    # Small tiles to exercise the multi-tile reduction path + dynamic HW slice.
    feats_big_mt = tiled(params, a_hat_big, node_features_big, corrupt=False,
                         tm=128, tk=128)
    jax.block_until_ready((feats_big, feats_big_mt))
    assert feats_big.shape == (N_NODES_BIG, N_HIDDEN)
    assert float(jnp.max(jnp.abs(feats_big - ref_big))) < 5e-2
    assert float(jnp.max(jnp.abs(feats_big_mt - ref_big))) < 5e-2

    # --- generation-aware dispatcher (fused-vs-tiled VMEM cutoff) ---
    feats_auto = auto(params, a_hat_big, node_features_big, corrupt=False)
    jax.block_until_ready(feats_auto)
    assert float(jnp.max(jnp.abs(feats_auto - ref_big))) < 5e-2

    print("KERNEL_OK")
</pallas_src>

<mosaic_0001>
module attributes {stable_mosaic.version = 11 : i64} {
  func.func @_fused_encoder_kernel(%arg0: memref<128x128xbf16, #tpu.memory_space<vmem>>, %arg1: memref<128x128xbf16, #tpu.memory_space<vmem>>, %arg2: memref<128x128xbf16, #tpu.memory_space<vmem>>, %arg3: memref<1x128xf32, #tpu.memory_space<vmem>>, %arg4: memref<128x128xbf16, #tpu.memory_space<vmem>>, %arg5: memref<1x128xf32, #tpu.memory_space<vmem>>, %arg6: memref<128x128xf32, #tpu.memory_space<vmem>>) attributes {dimension_semantics = [], scalar_prefetch = 0 : i64, scratch_operands = 0 : i64, tpu.core_type = #tpu.core_type<tc>} {
    %c0 = arith.constant 0 : index
    %c0_0 = arith.constant 0 : index
    %0 = vector.load %arg0[%c0, %c0_0] : memref<128x128xbf16, #tpu.memory_space<vmem>>, vector<128x128xbf16>
    %c0_1 = arith.constant 0 : index
    %c0_2 = arith.constant 0 : index
    %1 = vector.load %arg1[%c0_1, %c0_2] : memref<128x128xbf16, #tpu.memory_space<vmem>>, vector<128x128xbf16>
    %c0_3 = arith.constant 0 : index
    %c0_4 = arith.constant 0 : index
    %2 = vector.load %arg2[%c0_3, %c0_4] : memref<128x128xbf16, #tpu.memory_space<vmem>>, vector<128x128xbf16>
    %c0_5 = arith.constant 0 : index
    %c0_6 = arith.constant 0 : index
    %3 = vector.load %arg3[%c0_5, %c0_6] : memref<1x128xf32, #tpu.memory_space<vmem>>, vector<1x128xf32>
    %cst = arith.constant dense<0.000000e+00> : vector<128x128xf32>
    %4 = tpu.matmul %1, %2, %cst {dimension_numbers = #tpu.dot_dimension_numbers<[1], [0], [0], [1], [0, 0, 1, 1], [], []>} : vector<128x128xbf16>, vector<128x128xbf16>, vector<128x128xf32> -> vector<128x128xf32>
    %5 = arith.truncf %4 : vector<128x128xf32> to vector<128x128xbf16>
    %cst_7 = arith.constant dense<0.000000e+00> : vector<128x128xf32>
    %6 = tpu.matmul %0, %5, %cst_7 {dimension_numbers = #tpu.dot_dimension_numbers<[1], [0], [0], [1], [0, 0, 1, 1], [], []>} : vector<128x128xbf16>, vector<128x128xbf16>, vector<128x128xf32> -> vector<128x128xf32>
    %7 = vector.broadcast %3 : vector<1x128xf32> to vector<128x128xf32>
    %8 = arith.addf %6, %7 : vector<128x128xf32>
    %cst_8 = arith.constant 0.000000e+00 : f32
    %9 = vector.broadcast %cst_8 : f32 to vector<128x128xf32>
    %10 = arith.maximumf %8, %9 : vector<128x128xf32>
    %11 = arith.truncf %10 : vector<128x128xf32> to vector<128x128xbf16>
    %c0_9 = arith.constant 0 : index
    %c0_10 = arith.constant 0 : index
    %12 = vector.load %arg4[%c0_9, %c0_10] : memref<128x128xbf16, #tpu.memory_space<vmem>>, vector<128x128xbf16>
    %c0_11 = arith.constant 0 : index
    %c0_12 = arith.constant 0 : index
    %13 = vector.load %arg5[%c0_11, %c0_12] : memref<1x128xf32, #tpu.memory_space<vmem>>, vector<1x128xf32>
    %cst_13 = arith.constant dense<0.000000e+00> : vector<128x128xf32>
    %14 = tpu.matmul %11, %12, %cst_13 {dimension_numbers = #tpu.dot_dimension_numbers<[1], [0], [0], [1], [0, 0, 1, 1], [], []>} : vector<128x128xbf16>, vector<128x128xbf16>, vector<128x128xf32> -> vector<128x128xf32>
    %15 = arith.truncf %14 : vector<128x128xf32> to vector<128x128xbf16>
    %cst_14 = arith.constant dense<0.000000e+00> : vector<128x128xf32>
    %16 = tpu.matmul %0, %15, %cst_14 {dimension_numbers = #tpu.dot_dimension_numbers<[1], [0], [0], [1], [0, 0, 1, 1], [], []>} : vector<128x128xbf16>, vector<128x128xbf16>, vector<128x128xf32> -> vector<128x128xf32>
    %17 = vector.broadcast %13 : vector<1x128xf32> to vector<128x128xf32>
    %18 = arith.addf %16, %17 : vector<128x128xf32>
    %c0_15 = arith.constant 0 : index
    %c0_16 = arith.constant 0 : index
    %19 = vector.load %arg6[%c0_15, %c0_16] : memref<128x128xf32, #tpu.memory_space<vmem>>, vector<128x128xf32>
    tpu.vector_store %arg6[%c0_15, %c0_16], %18 {strides = array<i32>} : memref<128x128xf32, #tpu.memory_space<vmem>>, vector<128x128xf32>,
    return
  }
}

</mosaic_0001>

<bundles_post_ra>
// kernel: encoder_forward_fused.1
= control target key start
LH: loop header
LB: loop body
LE: loop exit
PB: predicated region body
PF: predicated region fallthrough
CT: control target
= control target key end

     0   :  { %s922_s2 = inlined_call_operand.vmem [shape: bf16[128,128], index: 2, kind: input, shape index: {}]   ;;  %s923_s1 = inlined_call_operand.vmem [shape: bf16[128,128], index: 1, kind: input, shape index: {}]   ;;  %s924_s3 = inlined_call_operand.vmem [shape: f32[1,128], index: 3, kind: input, shape index: {}]   ;;  %s925_s0 = inlined_call_operand.vmem [shape: bf16[128,128], index: 0, kind: input, shape index: {}]   ;;  %s926_s4 = inlined_call_operand.vmem [shape: bf16[128,128], index: 4, kind: input, shape index: {}]   ;;  %s927_s5 = inlined_call_operand.vmem [shape: f32[1,128], index: 5, kind: input, shape index: {}]   ;;  %s928_s6 = inlined_call_operand.vmem [shape: f32[128,128], index: 6, kind: output, shape index: {}]  }
   0x1   :  { %v694_v0 = vld [vmem:[%s922_s2 + $0x38] sm:$0xff]  ;;  %v693_v1 = vld [vmem:[%s922_s2 + $0x30] sm:$0xff]  ;;  %v692_v2 = vld [vmem:[%s922_s2 + $0x28] sm:$0xff] }
   0x2   :  { %168 = vmatpush.bf16.msra.mxu0 %v694_v0  ;;  %v691_v3 = vld [vmem:[%s922_s2 + $0x20] sm:$0xff]  ;;  %v690_v4 = vld [vmem:[%s922_s2 + $0x18] sm:$0xff]  ;;  %v689_v5 = vld [vmem:[%s922_s2 + $0x10] sm:$0xff] }
   0x3   :  { %v688_v6 = vld [vmem:[%s922_s2 + $0x8] sm:$0xff]  ;;  %v687_v7 = vld [vmem:[%s922_s2] sm:$0xff]  ;;  %v681_v10 = vld [vmem:[%s923_s1 + $0x10] sm:$0xff] }
   0x4   :  { %v679_v8 = vld [vmem:[%s923_s1] sm:$0xff]  ;;  %v680_v9 = vld [vmem:[%s923_s1 + $0x8] sm:$0xff]  ;;  %v682_v11 = vld [vmem:[%s923_s1 + $0x18] sm:$0xff] }
   0x5   :  { %v683_v12 = vld [vmem:[%s923_s1 + $0x20] sm:$0xff]  ;;  %v684_v13 = vld [vmem:[%s923_s1 + $0x28] sm:$0xff]  ;;  %v685_v14 = vld [vmem:[%s923_s1 + $0x30] sm:$0xff] }
   0x6   :  { %169 = vmatpush.bf16.msra.mxu0 %v693_v1  ;;  %v686_v15 = vld [vmem:[%s923_s1 + $0x38] sm:$0xff]  ;;  %v791_v40 = vld [vmem:[%s925_s0] sm:$0xff]  ;;  %v797_v41 = vld [vmem:[%s925_s0 + $0x8] sm:$0xff] }
   0x7   :  { %v803_v42 = vld [vmem:[%s925_s0 + $0x10] sm:$0xff]  ;;  %v809_v43 = vld [vmem:[%s925_s0 + $0x18] sm:$0xff]  ;;  %v815_v44 = vld [vmem:[%s925_s0 + $0x20] sm:$0xff] }
   0x8   :  { %v702_v45 = vld [vmem:[%s926_s4 + $0x38] sm:$0xff]  ;;  %v824_v46 = vld [vmem:[%s925_s0 + $0x28] sm:$0xff]  ;;  %v701_v47 = vld [vmem:[%s926_s4 + $0x30] sm:$0xff] }
   0x9   :  { %414 = vmatpush.bf16.msra.mxu2 %v702_v45  ;;  %v700_v48 = vld [vmem:[%s926_s4 + $0x28] sm:$0xff]  ;;  %v699_v49 = vld [vmem:[%s926_s4 + $0x20] sm:$0xff]  ;;  %v698_v50 = vld [vmem:[%s926_s4 + $0x18] sm:$0xff] }
   0xa   :  { %170 = vmatpush.bf16.msra.mxu0 %v692_v2  ;;  %v842_v51 = vld [vmem:[%s925_s0 + $0x30] sm:$0xff]  ;;  %v696_v53 = vld [vmem:[%s926_s4 + $0x8] sm:$0xff]  ;;  %v695_v54 = vld [vmem:[%s926_s4] sm:$0xff] }
   0xb   :  { %v697_v52 = vld [vmem:[%s926_s4 + $0x10] sm:$0xff]  ;;  %v857_v55 = vld [vmem:[%s925_s0 + $0x38] sm:$0xff]  ;;  %v703_v57 = vld [vmem:[%s924_s3] ss:$0 sm:$0xff] }
   0xd   :  { %415 = vmatpush.bf16.msra.mxu2 %v701_v47 }
   0xe   :  { %171 = vmatpush.bf16.msra.mxu0 %v691_v3 }
  0x11   :  { %416 = vmatpush.bf16.msra.mxu2 %v700_v48 }
  0x12   :  { %172 = vmatpush.bf16.msra.mxu0 %v690_v4 }
  0x15   :  { %417 = vmatpush.bf16.msra.mxu2 %v699_v49 }
  0x16   :  { %173 = vmatpush.bf16.msra.mxu0 %v689_v5 }
  0x19   :  { %418 = vmatpush.bf16.msra.mxu2 %v698_v50 }
  0x1a   :  { %174 = vmatpush.bf16.msra.mxu0 %v688_v6 }
  0x1d   :  { %419 = vmatpush.bf16.msra.mxu2 %v697_v52 }
  0x1e   :  { %175 = vmatpush.bf16.msra.mxu0 %v687_v7 }
  0x21   :  { %176 = vmatmul.bf16.vlgmr.msra.gmra.mxu0 %v679_v8  ;;  %420 = vmatpush.bf16.msra.mxu2 %v696_v53 }
  0x25   :  { %421 = vmatpush.bf16.msra.mxu2 %v695_v54 }
  0x31   :  { %181 = vmatmul.bf16.gmra.mxu0 %v680_v9 }
  0x41   :  { %186 = vmatmul.bf16.gmra.mxu0 %v681_v10 }
  0x51   :  { %191 = vmatmul.bf16.gmra.mxu0 %v682_v11 }
  0x61   :  { %196 = vmatmul.bf16.gmra.mxu0 %v683_v12 }
  0x71   :  { %201 = vmatmul.bf16.gmra.mxu0 %v684_v13 }
  0x81   :  { %206 = vmatmul.bf16.gmra.mxu0 %v685_v14 }
  0x91   :  { %211 = vmatmul.bf16.gmra.mxu0 %v686_v15 }
  0x9e   :  { %v177_v16 = vpop.f32.mrf.mxu0 }
  0xa6   :  { %v179_v17 = vpop.f32.mrf.mxu0 }
  0xa7   :  { %v217_v18 = vpack.c.bf16 %v179_v17, %v177_v16 }
  0xae   :  { %v182_v19 = vpop.f32.mrf.mxu0 }
  0xb6   :  { %v184_v20 = vpop.f32.mrf.mxu0 }
  0xb7   :  { %v218_v21 = vpack.c.bf16 %v184_v20, %v182_v19 }
  0xbe   :  { %v187_v22 = vpop.f32.mrf.mxu0 }
  0xc6   :  { %v189_v23 = vpop.f32.mrf.mxu0 }
  0xc7   :  { %v219_v24 = vpack.c.bf16 %v189_v23, %v187_v22 }
  0xce   :  { %v192_v25 = vpop.f32.mrf.mxu0 }
  0xd6   :  { %v194_v26 = vpop.f32.mrf.mxu0 }
  0xd7   :  { %v220_v27 = vpack.c.bf16 %v194_v26, %v192_v25 }
  0xde   :  { %v197_v28 = vpop.f32.mrf.mxu0 }
  0xe6   :  { %v199_v29 = vpop.f32.mrf.mxu0 }
  0xe7   :  { %v221_v39 = vpack.c.bf16 %v199_v29, %v197_v28 }
  0xee   :  { %v202_v30 = vpop.f32.mrf.mxu0 }
  0xf6   :  { %v204_v31 = vpop.f32.mrf.mxu0 }
  0xf7   :  { %v222_v38 = vpack.c.bf16 %v204_v31, %v202_v30 }
  0xfe   :  { %v207_v32 = vpop.f32.mrf.mxu0 }
 0x106   :  { %v209_v33 = vpop.f32.mrf.mxu0 }
 0x107   :  { %v223_v37 = vpack.c.bf16 %v209_v33, %v207_v32 }
 0x10e   :  { %v212_v34 = vpop.f32.mrf.mxu0 }
 0x116   :  { %v214_v35 = vpop.f32.mrf.mxu0 }
 0x117   :  { %v224_v36 = vpack.c.bf16 %v214_v35, %v212_v34 }
 0x119   :  { %276 = vmatpush.bf16.msra.mxu1 %v224_v36 }
 0x11d   :  { %277 = vmatpush.bf16.msra.mxu1 %v223_v37 }
 0x121   :  { %278 = vmatpush.bf16.msra.mxu1 %v222_v38 }
 0x125   :  { %279 = vmatpush.bf16.msra.mxu1 %v221_v39 }
 0x129   :  { %280 = vmatpush.bf16.msra.mxu1 %v220_v27 }
 0x12d   :  { %281 = vmatpush.bf16.msra.mxu1 %v219_v24 }
 0x131   :  { %282 = vmatpush.bf16.msra.mxu1 %v218_v21 }
 0x135   :  { %283 = vmatpush.bf16.msra.mxu1 %v217_v18 }
 0x138   :  { %284 = vmatmul.bf16.vlgmr.msra.gmra.mxu1 %v791_v40 }
 0x148   :  { %289 = vmatmul.bf16.gmra.mxu1 %v797_v41 }
 0x158   :  { %294 = vmatmul.bf16.gmra.mxu1 %v803_v42 }
 0x168   :  { %299 = vmatmul.bf16.gmra.mxu1 %v809_v43 }
 0x178   :  { %304 = vmatmul.bf16.gmra.mxu1 %v815_v44 }
 0x188   :  { %309 = vmatmul.bf16.gmra.mxu1 %v824_v46 }
 0x198   :  { %314 = vmatmul.bf16.gmra.mxu1 %v842_v51 }
 0x1a8   :  { %319 = vmatmul.bf16.gmra.mxu1 %v857_v55 }
 0x1b5   :  { %v285_v56 = vpop.f32.mrf.mxu1 }
 0x1b6   :  { %v286_v58 = vadd.f32 %v703_v57, %v285_v56 }
 0x1b8   :  { %v325_v61 = vmax.f32 %v286_v58, 0.0 }
 0x1bd   :  { %v287_v59 = vpop.f32.mrf.mxu1 }
 0x1be   :  { %v288_v60 = vadd.f32 %v703_v57, %v287_v59 }
 0x1c0   :  { %v326_v62 = vmax.f32 %v288_v60, 0.0 }
 0x1c2   :  { %v341_v63 = vpack.c.bf16 %v326_v62, %v325_v61 }
 0x1c4   :  { %422 = vmatmul.bf16.vlgmr.msra.gmra.mxu2 %v341_v63 }
 0x1c5   :  { %v290_v0 = vpop.f32.mrf.mxu1 }
 0x1c6   :  { %v291_v1 = vadd.f32 %v703_v57, %v290_v0 }
 0x1c8   :  { %v327_v4 = vmax.f32 %v291_v1, 0.0 }
 0x1cd   :  { %v292_v2 = vpop.f32.mrf.mxu1 }
 0x1ce   :  { %v293_v3 = vadd.f32 %v703_v57, %v292_v2 }
 0x1d0   :  { %v328_v5 = vmax.f32 %v293_v3, 0.0 }
 0x1d2   :  { %v342_v6 = vpack.c.bf16 %v328_v5, %v327_v4 }
 0x1d4   :  { %427 = vmatmul.bf16.gmra.mxu2 %v342_v6 }
 0x1d5   :  { %v295_v7 = vpop.f32.mrf.mxu1 }
 0x1d6   :  { %v296_v8 = vadd.f32 %v703_v57, %v295_v7 }
 0x1d8   :  { %v329_v11 = vmax.f32 %v296_v8, 0.0 }
 0x1dd   :  { %v297_v9 = vpop.f32.mrf.mxu1 }
 0x1de   :  { %v298_v10 = vadd.f32 %v703_v57, %v297_v9 }
 0x1e0   :  { %v330_v12 = vmax.f32 %v298_v10, 0.0 }
 0x1e2   :  { %v343_v13 = vpack.c.bf16 %v330_v12, %v329_v11 }
 0x1e4   :  { %432 = vmatmul.bf16.gmra.mxu2 %v343_v13 }
 0x1e5   :  { %v300_v14 = vpop.f32.mrf.mxu1 }
 0x1e6   :  { %v301_v15 = vadd.f32 %v703_v57, %v300_v14 }
 0x1e8   :  { %v331_v18 = vmax.f32 %v301_v15, 0.0 }
 0x1ed   :  { %v302_v16 = vpop.f32.mrf.mxu1 }
 0x1ee   :  { %v303_v17 = vadd.f32 %v703_v57, %v302_v16 }
 0x1f0   :  { %v332_v19 = vmax.f32 %v303_v17, 0.0  ;;  %v704_v17 = vld [vmem:[%s927_s5] ss:$0 sm:$0xff] }
 0x1f2   :  { %v344_v20 = vpack.c.bf16 %v332_v19, %v331_v18 }
 0x1f4   :  { %437 = vmatmul.bf16.gmra.mxu2 %v344_v20 }
 0x1f5   :  { %v305_v21 = vpop.f32.mrf.mxu1 }
 0x1f6   :  { %v306_v22 = vadd.f32 %v703_v57, %v305_v21 }
 0x1f8   :  { %v333_v25 = vmax.f32 %v306_v22, 0.0 }
 0x1fd   :  { %v307_v23 = vpop.f32.mrf.mxu1 }
 0x1fe   :  { %v308_v24 = vadd.f32 %v703_v57, %v307_v23 }
 0x200   :  { %v334_v26 = vmax.f32 %v308_v24, 0.0 }
 0x202   :  { %v345_v27 = vpack.c.bf16 %v334_v26, %v333_v25 }
 0x204   :  { %442 = vmatmul.bf16.gmra.mxu2 %v345_v27 }
 0x205   :  { %v310_v28 = vpop.f32.mrf.mxu1 }
 0x206   :  { %v311_v29 = vadd.f32 %v703_v57, %v310_v28 }
 0x208   :  { %v335_v32 = vmax.f32 %v311_v29, 0.0 }
 0x20d   :  { %v312_v30 = vpop.f32.mrf.mxu1 }
 0x20e   :  { %v313_v31 = vadd.f32 %v703_v57, %v312_v30 }
 0x210   :  { %v336_v33 = vmax.f32 %v313_v31, 0.0 }
 0x212   :  { %v346_v34 = vpack.c.bf16 %v336_v33, %v335_v32 }
 0x214   :  { %447 = vmatmul.bf16.gmra.mxu2 %v346_v34 }
 0x215   :  { %v315_v35 = vpop.f32.mrf.mxu1 }
 0x216   :  { %v316_v36 = vadd.f32 %v703_v57, %v315_v35 }
 0x218   :  { %v337_v39 = vmax.f32 %v316_v36, 0.0 }
 0x21d   :  { %v317_v37 = vpop.f32.mrf.mxu1 }
 0x21e   :  { %v318_v38 = vadd.f32 %v703_v57, %v317_v37 }
 0x220   :  { %v338_v45 = vmax.f32 %v318_v38, 0.0 }
 0x222   :  { %v347_v47 = vpack.c.bf16 %v338_v45, %v337_v39 }
 0x224   :  { %452 = vmatmul.bf16.gmra.mxu2 %v347_v47 }
 0x225   :  { %v320_v48 = vpop.f32.mrf.mxu1 }
 0x226   :  { %v321_v49 = vadd.f32 %v703_v57, %v320_v48 }
 0x228   :  { %v339_v53 = vmax.f32 %v321_v49, 0.0 }
 0x22d   :  { %v322_v50 = vpop.f32.mrf.mxu1 }
 0x22e   :  { %v323_v52 = vadd.f32 %v703_v57, %v322_v50 }
 0x230   :  { %v340_v54 = vmax.f32 %v323_v52, 0.0 }
 0x232   :  { %v348_v56 = vpack.c.bf16 %v340_v54, %v339_v53 }
 0x234   :  { %457 = vmatmul.bf16.gmra.mxu2 %v348_v56 }
 0x247   :  { %v423_v58 = vpop.f32.mrf.mxu2 }
 0x24f   :  { %v425_v59 = vpop.f32.mrf.mxu2 }
 0x250   :  { %v463_v60 = vpack.c.bf16 %v425_v59, %v423_v58 }
 0x257   :  { %v428_v61 = vpop.f32.mrf.mxu2 }
 0x25f   :  { %v430_v62 = vpop.f32.mrf.mxu2 }
 0x260   :  { %v464_v63 = vpack.c.bf16 %v430_v62, %v428_v61 }
 0x267   :  { %v433_v0 = vpop.f32.mrf.mxu2 }
 0x26f   :  { %v435_v1 = vpop.f32.mrf.mxu2 }
 0x270   :  { %v465_v2 = vpack.c.bf16 %v435_v1, %v433_v0 }
 0x277   :  { %v438_v3 = vpop.f32.mrf.mxu2 }
 0x27f   :  { %v440_v4 = vpop.f32.mrf.mxu2 }
 0x280   :  { %v466_v5 = vpack.c.bf16 %v440_v4, %v438_v3 }
 0x287   :  { %v443_v6 = vpop.f32.mrf.mxu2 }
 0x28f   :  { %v445_v7 = vpop.f32.mrf.mxu2 }
 0x290   :  { %v467_v16 = vpack.c.bf16 %v445_v7, %v443_v6 }
 0x297   :  { %v448_v8 = vpop.f32.mrf.mxu2 }
 0x29f   :  { %v450_v57 = vpop.f32.mrf.mxu2 }
 0x2a0   :  { %v468_v15 = vpack.c.bf16 %v450_v57, %v448_v8 }
 0x2a7   :  { %v453_v9 = vpop.f32.mrf.mxu2 }
 0x2af   :  { %v455_v10 = vpop.f32.mrf.mxu2 }
 0x2b0   :  { %v469_v14 = vpack.c.bf16 %v455_v10, %v453_v9 }
 0x2b7   :  { %v458_v11 = vpop.f32.mrf.mxu2 }
 0x2bf   :  { %v460_v12 = vpop.f32.mrf.mxu2 }
 0x2c0   :  { %v470_v13 = vpack.c.bf16 %v460_v12, %v458_v11 }
 0x2c2   :  { %474 = vmatpush.bf16.msra.mxu3 %v470_v13 }
 0x2c6   :  { %475 = vmatpush.bf16.msra.mxu3 %v469_v14 }
 0x2ca   :  { %476 = vmatpush.bf16.msra.mxu3 %v468_v15 }
 0x2ce   :  { %477 = vmatpush.bf16.msra.mxu3 %v467_v16 }
 0x2d2   :  { %478 = vmatpush.bf16.msra.mxu3 %v466_v5 }
 0x2d6   :  { %479 = vmatpush.bf16.msra.mxu3 %v465_v2 }
 0x2da   :  { %480 = vmatpush.bf16.msra.mxu3 %v464_v63 }
 0x2de   :  { %481 = vmatpush.bf16.msra.mxu3 %v463_v60 }
 0x2e1   :  { %482 = vmatmul.bf16.vlgmr.msra.gmra.mxu3 %v791_v40 }
 0x2f1   :  { %487 = vmatmul.bf16.gmra.mxu3 %v797_v41 }
 0x301   :  { %492 = vmatmul.bf16.gmra.mxu3 %v803_v42 }
 0x311   :  { %497 = vmatmul.bf16.gmra.mxu3 %v809_v43 }
 0x321   :  { %502 = vmatmul.bf16.gmra.mxu3 %v815_v44 }
 0x331   :  { %507 = vmatmul.bf16.gmra.mxu3 %v824_v46 }
 0x341   :  { %512 = vmatmul.bf16.gmra.mxu3 %v842_v51 }
 0x351   :  { %517 = vmatmul.bf16.gmra.mxu3 %v857_v55 }
 0x364   :  { %v483_v18 = vpop.f32.mrf.mxu3 }
 0x365   :  { %v484_v40 = vadd.f32 %v704_v17, %v483_v18 }
 0x367   :  { %523 = vst [vmem:[%s928_s6] sm:$0xff] %v484_v40 }
 0x36c   :  { %v485_v41 = vpop.f32.mrf.mxu3 }
 0x36d   :  { %v486_v42 = vadd.f32 %v704_v17, %v485_v41 }
 0x36f   :  { %524 = vst [vmem:[%s928_s6 + $0x8] sm:$0xff] %v486_v42 }
 0x374   :  { %v488_v43 = vpop.f32.mrf.mxu3 }
 0x375   :  { %v489_v44 = vadd.f32 %v704_v17, %v488_v43 }
 0x377   :  { %525 = vst [vmem:[%s928_s6 + $0x10] sm:$0xff] %v489_v44 }
 0x37c   :  { %v490_v46 = vpop.f32.mrf.mxu3 }
 0x37d   :  { %v491_v51 = vadd.f32 %v704_v17, %v490_v46 }
 0x37f   :  { %526 = vst [vmem:[%s928_s6 + $0x18] sm:$0xff] %v491_v51 }
 0x384   :  { %v493_v55 = vpop.f32.mrf.mxu3 }
 0x385   :  { %v494_v19 = vadd.f32 %v704_v17, %v493_v55 }
 0x387   :  { %527 = vst [vmem:[%s928_s6 + $0x20] sm:$0xff] %v494_v19 }
 0x38c   :  { %v495_v20 = vpop.f32.mrf.mxu3 }
 0x38d   :  { %v496_v21 = vadd.f32 %v704_v17, %v495_v20 }
 0x38f   :  { %528 = vst [vmem:[%s928_s6 + $0x28] sm:$0xff] %v496_v21 }
 0x394   :  { %v498_v22 = vpop.f32.mrf.mxu3 }
 0x395   :  { %v499_v23 = vadd.f32 %v704_v17, %v498_v22 }
 0x397   :  { %529 = vst [vmem:[%s928_s6 + $0x30] sm:$0xff] %v499_v23 }
 0x39c   :  { %v500_v24 = vpop.f32.mrf.mxu3 }
 0x39d   :  { %v501_v25 = vadd.f32 %v704_v17, %v500_v24 }
 0x39f   :  { %530 = vst [vmem:[%s928_s6 + $0x38] sm:$0xff] %v501_v25 }
 0x3a4   :  { %v503_v26 = vpop.f32.mrf.mxu3 }
 0x3a5   :  { %v504_v27 = vadd.f32 %v704_v17, %v503_v26 }
 0x3a7   :  { %531 = vst [vmem:[%s928_s6 + $0x40] sm:$0xff] %v504_v27 }
 0x3ac   :  { %v505_v28 = vpop.f32.mrf.mxu3 }
 0x3ad   :  { %v506_v29 = vadd.f32 %v704_v17, %v505_v28 }
 0x3af   :  { %532 = vst [vmem:[%s928_s6 + $0x48] sm:$0xff] %v506_v29 }
 0x3b4   :  { %v508_v30 = vpop.f32.mrf.mxu3 }
 0x3b5   :  { %v509_v31 = vadd.f32 %v704_v17, %v508_v30 }
 0x3b7   :  { %533 = vst [vmem:[%s928_s6 + $0x50] sm:$0xff] %v509_v31 }
 0x3bc   :  { %v510_v32 = vpop.f32.mrf.mxu3 }
 0x3bd   :  { %v511_v33 = vadd.f32 %v704_v17, %v510_v32 }
 0x3bf   :  { %534 = vst [vmem:[%s928_s6 + $0x58] sm:$0xff] %v511_v33 }
 0x3c4   :  { %v513_v34 = vpop.f32.mrf.mxu3 }
 0x3c5   :  { %v514_v35 = vadd.f32 %v704_v17, %v513_v34 }
 0x3c7   :  { %535 = vst [vmem:[%s928_s6 + $0x60] sm:$0xff] %v514_v35 }
 0x3cc   :  { %v515_v36 = vpop.f32.mrf.mxu3 }
 0x3cd   :  { %v516_v37 = vadd.f32 %v704_v17, %v515_v36 }
 0x3cf   :  { %536 = vst [vmem:[%s928_s6 + $0x68] sm:$0xff] %v516_v37 }
 0x3d4   :  { %v518_v38 = vpop.f32.mrf.mxu3 }
 0x3d5   :  { %v519_v39 = vadd.f32 %v704_v17, %v518_v38 }
 0x3d7   :  { %537 = vst [vmem:[%s928_s6 + $0x70] sm:$0xff] %v519_v39 }
 0x3dc   :  { %v520_v45 = vpop.f32.mrf.mxu3 }
 0x3dd   :  { %v521_v47 = vadd.f32 %v704_v17, %v520_v45 }
 0x3df   :  { %538 = vst [vmem:[%s928_s6 + $0x78] sm:$0xff] %v521_v47 }

</bundles_post_ra>
